<compile_context>
chip_gen: v5e
topology: v5e:2x2
jax: 0.10.0
libtpu: 0.0.40
codegen_flags: <defaults>
</compile_context>

<pallas_src>
import functools

import jax
import jax.numpy as jnp
from jax.experimental import pallas as pl
from jax.experimental.pallas import tpu as pltpu


def _round_up(x, m):
    return (x + m - 1) // m * m


def cbow_kernel(ids_ref, emb_ref, w1_ref, b1_ref, w2_ref, b2_ref, out_ref,
                *, num_classes):
    """Fused: in-kernel embedding gather+sum -> linear1 -> relu -> linear2 -> log_softmax.

    ids_ref : (TB, S)  int32  token ids for this batch tile (streamed)
    emb_ref : (Vp, D)  bf16   zero-padded embedding table (VMEM resident)
    w1_ref  : (D, H)   bf16
    b1_ref  : (1, H)   f32
    w2_ref  : (H, CP)  bf16   class dim zero-padded to CP (lane-dense)
    b2_ref  : (1, CP)  f32
    out_ref : (TB, CP) f32    log-probs; first `num_classes` lanes are valid
    """
    tb, s = ids_ref.shape
    vp = emb_ref.shape[0]

    # --- Embedding gather + sum over sequence as an MXU matmul.
    ids = ids_ref[...]                                              # (TB, S)
    vocab_iota = jax.lax.broadcasted_iota(jnp.int32, (tb, s, vp), 2)
    onehot = (ids[:, :, None] == vocab_iota).astype(jnp.float32)    # (TB, S, Vp)
    counts = jnp.sum(onehot, axis=1)                                # (TB, Vp)
    # counts are small integers (<= S) -> exactly representable in bf16.
    embeds = jnp.dot(counts.astype(jnp.bfloat16), emb_ref[...],
                     preferred_element_type=jnp.float32)            # (TB, D) f32

    # --- linear1 + relu.  Dropout is identity in eval mode.
    h = jnp.dot(embeds.astype(jnp.bfloat16), w1_ref[...],
                preferred_element_type=jnp.float32) + b1_ref[...]
    h = jnp.maximum(h, 0.0)

    # --- linear2 into the lane-padded class dim.
    logits = jnp.dot(h.astype(jnp.bfloat16), w2_ref[...],
                     preferred_element_type=jnp.float32) + b2_ref[...]

    # Mask padded class lanes so log_softmax over CP == log_softmax over C.
    lane = jax.lax.broadcasted_iota(jnp.int32, logits.shape, 1)
    logits = jnp.where(lane < num_classes, logits, jnp.float32(-1e30))

    # --- log_softmax along the class dim (f32, max-shifted).
    m = jnp.max(logits, axis=1, keepdims=True)
    shifted = logits - m
    lse = jnp.log(jnp.sum(jnp.exp(shifted), axis=1, keepdims=True))
    out_ref[...] = shifted - lse


@functools.partial(jax.jit, static_argnames=("block_b",))
def cbow_forward(token_ids, emb_table, w1_t, b1, w2_t, b2, *, block_b=128):
    """token_ids: (B, S) int32. Returns (B, C) log-probabilities (f32)."""
    B, S = token_ids.shape
    V2, D = emb_table.shape          # VOCAB_SIZE + 2, WORD_DIM
    H = w1_t.shape[1]                # 128
    C = w2_t.shape[1]                # CLASS_SIZE

    # Batch tile: multiple of 8 sublanes, up to block_b (128 is MXU-friendly M).
    TB = min(block_b, _round_up(B, 8))
    B_pad = _round_up(B, TB)
    Vp = _round_up(V2, 128)          # lane-dense counts / MXU K dim
    CP = _round_up(C, 128)           # lane-dense output / MXU N dim

    ids = jnp.pad(token_ids.astype(jnp.int32), ((0, B_pad - B), (0, 0)))
    emb_p = jnp.pad(emb_table.astype(jnp.float32),
                    ((0, Vp - V2), (0, 0))).astype(jnp.bfloat16)
    w1_b = w1_t.astype(jnp.bfloat16)
    b1_row = b1.reshape(1, H).astype(jnp.float32)
    w2_p = jnp.pad(w2_t.astype(jnp.float32),
                   ((0, 0), (0, CP - C))).astype(jnp.bfloat16)
    b2_row = jnp.pad(b2.astype(jnp.float32), (0, CP - C)).reshape(1, CP)

    kernel = functools.partial(cbow_kernel, num_classes=C)

    out_padded = pl.pallas_call(
        kernel,
        out_shape=jax.ShapeDtypeStruct((B_pad, CP), jnp.float32),
        grid=(B_pad // TB,),
        in_specs=[
            pl.BlockSpec((TB, S), lambda i: (i, 0)),    # token ids (streamed per tile)
            pl.BlockSpec((Vp, D), lambda i: (0, 0)),    # embedding table (resident)
            pl.BlockSpec((D, H), lambda i: (0, 0)),     # W1^T (resident)
            pl.BlockSpec((1, H), lambda i: (0, 0)),     # b1
            pl.BlockSpec((H, CP), lambda i: (0, 0)),    # W2^T padded (resident)
            pl.BlockSpec((1, CP), lambda i: (0, 0)),    # b2 padded
        ],
        out_specs=pl.BlockSpec((TB, CP), lambda i: (i, 0)),
        compiler_params=pltpu.CompilerParams(
            dimension_semantics=("parallel",),
            vmem_limit_bytes=32 * 1024 * 1024,
        ),
    )(ids, emb_p, w1_b, b1_row, w2_p, b2_row)

    return out_padded[:B, :C]


def reference_forward(token_ids, emb_table, w1_t, b1, w2_t, b2):
    """Pure-JAX f32 reference of the PyTorch forward."""
    emb = jnp.take(emb_table, token_ids, axis=0)          # (B, S, D)
    embeds = jnp.sum(emb, axis=1)                         # (B, D)
    h = jnp.maximum(embeds @ w1_t + b1, 0.0)
    logits = h @ w2_t + b2
    return jax.nn.log_softmax(logits, axis=1)


if __name__ == "__main__":
    # Small shapes implied by the module.
    BATCH_SIZE = 2
    SEQ_LEN = 8
    WORD_DIM = 32
    VOCAB_SIZE = 20
    CLASS_SIZE = 4
    HIDDEN = 128

    key = jax.random.PRNGKey(0)
    k_wv, k_w1, k_b1, k_w2, k_b2, k_ids = jax.random.split(key, 6)

    # Embedding table == WV_MATRIX, shape (VOCAB_SIZE + 2, WORD_DIM).
    emb_table = jax.random.normal(k_wv, (VOCAB_SIZE + 2, WORD_DIM),
                                  dtype=jnp.float32) * 0.1
    # nn.Linear(WORD_DIM, 128): weight (128, WORD_DIM) -> passed transposed.
    w1_t = jax.random.normal(k_w1, (WORD_DIM, HIDDEN), dtype=jnp.float32) * 0.1
    b1 = jax.random.normal(k_b1, (HIDDEN,), dtype=jnp.float32) * 0.1
    # nn.Linear(128, CLASS_SIZE): weight (CLASS_SIZE, 128) -> passed transposed.
    w2_t = jax.random.normal(k_w2, (HIDDEN, CLASS_SIZE), dtype=jnp.float32) * 0.1
    b2 = jax.random.normal(k_b2, (CLASS_SIZE,), dtype=jnp.float32) * 0.1

    # Token ids (padding index VOCAB_SIZE + 1 is a legal id).
    token_ids = jax.random.randint(k_ids, (BATCH_SIZE, SEQ_LEN), 0,
                                   VOCAB_SIZE + 2, dtype=jnp.int32)

    out = cbow_forward(token_ids, emb_table, w1_t, b1, w2_t, b2)
    out = jax.block_until_ready(out)

    ref = reference_forward(token_ids, emb_table, w1_t, b1, w2_t, b2)
    assert out.shape == (BATCH_SIZE, CLASS_SIZE)
    # Kernel carries weights/activations in bf16 (f32 accumulation) per the
    # perf feedback; tolerance accounts for bf16 rounding vs. the f32 reference.
    assert jnp.allclose(out, ref, atol=5e-2, rtol=5e-2), (
        f"max abs err = {jnp.max(jnp.abs(out - ref))}")

    # TODO(synk): training-mode dropout (RNG mask) not implemented; module is
    # evaluated in inference mode where F.dropout is the identity.
    print("KERNEL_OK")
</pallas_src>

<mosaic_0001>
module attributes {stable_mosaic.version = 11 : i64} {
  func.func @cbow_kernel(%arg0: i32, %arg1: memref<8x8xi32, #tpu.memory_space<vmem>>, %arg2: memref<128x32xbf16, #tpu.memory_space<vmem>>, %arg3: memref<32x128xbf16, #tpu.memory_space<vmem>>, %arg4: memref<1x128xf32, #tpu.memory_space<vmem>>, %arg5: memref<128x128xbf16, #tpu.memory_space<vmem>>, %arg6: memref<1x128xf32, #tpu.memory_space<vmem>>, %arg7: memref<8x128xf32, #tpu.memory_space<vmem>>) attributes {dimension_semantics = [#tpu.dimension_semantics<parallel>], iteration_bounds = array<i64: 1>, scalar_prefetch = 0 : i64, scratch_operands = 0 : i64, tpu.core_type = #tpu.core_type<tc>, window_params = [{transform_indices = @transform_0, window_bounds = array<i64: 8, 8>}, {pipeline_mode = #tpu.pipeline_mode<synchronous>, transform_indices = @transform_1, window_bounds = array<i64: 128, 32>}, {pipeline_mode = #tpu.pipeline_mode<synchronous>, transform_indices = @transform_2, window_bounds = array<i64: 32, 128>}, {pipeline_mode = #tpu.pipeline_mode<synchronous>, transform_indices = @transform_3, window_bounds = array<i64: 1, 128>}, {pipeline_mode = #tpu.pipeline_mode<synchronous>, transform_indices = @transform_4, window_bounds = array<i64: 128, 128>}, {pipeline_mode = #tpu.pipeline_mode<synchronous>, transform_indices = @transform_5, window_bounds = array<i64: 1, 128>}, {transform_indices = @transform_6, window_bounds = array<i64: 8, 128>}]} {
    %c0 = arith.constant 0 : index
    %c0_0 = arith.constant 0 : index
    %0 = vector.load %arg1[%c0, %c0_0] : memref<8x8xi32, #tpu.memory_space<vmem>>, vector<8x8xi32>
    %1 = tpu.iota {dimensions = array<i32: 2>} : vector<8x8x128xi32>
    %2 = vector.shape_cast %0 : vector<8x8xi32> to vector<8x8x1xi32>
    %3 = vector.broadcast %2 : vector<8x8x1xi32> to vector<8x8x128xi32>
    %4 = arith.cmpi eq, %3, %1 : vector<8x8x128xi32>
    %5 = arith.extui %4 : vector<8x8x128xi1> to vector<8x8x128xi32>
    %6 = arith.sitofp %5 : vector<8x8x128xi32> to vector<8x8x128xf32>
    %cst = arith.constant dense<0.000000e+00> : vector<8x128xf32>
    %7 = vector.multi_reduction <add>, %6, %cst [1] : vector<8x8x128xf32> to vector<8x128xf32>
    %8 = arith.truncf %7 : vector<8x128xf32> to vector<8x128xbf16>
    %c0_1 = arith.constant 0 : index
    %c0_2 = arith.constant 0 : index
    %9 = vector.load %arg2[%c0_1, %c0_2] : memref<128x32xbf16, #tpu.memory_space<vmem>>, vector<128x32xbf16>
    %cst_3 = arith.constant dense<0.000000e+00> : vector<8x32xf32>
    %10 = tpu.matmul %8, %9, %cst_3 {dimension_numbers = #tpu.dot_dimension_numbers<[1], [0], [0], [1], [0, 0, 1, 1], [], []>} : vector<8x128xbf16>, vector<128x32xbf16>, vector<8x32xf32> -> vector<8x32xf32>
    %11 = arith.truncf %10 : vector<8x32xf32> to vector<8x32xbf16>
    %c0_4 = arith.constant 0 : index
    %c0_5 = arith.constant 0 : index
    %12 = vector.load %arg3[%c0_4, %c0_5] : memref<32x128xbf16, #tpu.memory_space<vmem>>, vector<32x128xbf16>
    %cst_6 = arith.constant dense<0.000000e+00> : vector<8x128xf32>
    %13 = tpu.matmul %11, %12, %cst_6 {dimension_numbers = #tpu.dot_dimension_numbers<[1], [0], [0], [1], [0, 0, 1, 1], [], []>} : vector<8x32xbf16>, vector<32x128xbf16>, vector<8x128xf32> -> vector<8x128xf32>
    %c0_7 = arith.constant 0 : index
    %c0_8 = arith.constant 0 : index
    %14 = vector.load %arg4[%c0_7, %c0_8] : memref<1x128xf32, #tpu.memory_space<vmem>>, vector<1x128xf32>
    %15 = vector.broadcast %14 : vector<1x128xf32> to vector<8x128xf32>
    %16 = arith.addf %13, %15 : vector<8x128xf32>
    %cst_9 = arith.constant 0.000000e+00 : f32
    %17 = vector.broadcast %cst_9 : f32 to vector<8x128xf32>
    %18 = arith.maximumf %16, %17 : vector<8x128xf32>
    %19 = arith.truncf %18 : vector<8x128xf32> to vector<8x128xbf16>
    %c0_10 = arith.constant 0 : index
    %c0_11 = arith.constant 0 : index
    %20 = vector.load %arg5[%c0_10, %c0_11] : memref<128x128xbf16, #tpu.memory_space<vmem>>, vector<128x128xbf16>
    %cst_12 = arith.constant dense<0.000000e+00> : vector<8x128xf32>
    %21 = tpu.matmul %19, %20, %cst_12 {dimension_numbers = #tpu.dot_dimension_numbers<[1], [0], [0], [1], [0, 0, 1, 1], [], []>} : vector<8x128xbf16>, vector<128x128xbf16>, vector<8x128xf32> -> vector<8x128xf32>
    %c0_13 = arith.constant 0 : index
    %c0_14 = arith.constant 0 : index
    %22 = vector.load %arg6[%c0_13, %c0_14] : memref<1x128xf32, #tpu.memory_space<vmem>>, vector<1x128xf32>
    %23 = vector.broadcast %22 : vector<1x128xf32> to vector<8x128xf32>
    %24 = arith.addf %21, %23 : vector<8x128xf32>
    %25 = tpu.iota {dimensions = array<i32: 1>} : vector<8x128xi32>
    %c4_i32 = arith.constant 4 : i32
    %26 = vector.broadcast %c4_i32 : i32 to vector<8x128xi32>
    %27 = arith.cmpi slt, %25, %26 : vector<8x128xi32>
    %cst_15 = arith.constant -1.000000e+30 : f32
    %28 = vector.broadcast %cst_15 : f32 to vector<8x128xf32>
    %29 = arith.select %27, %24, %28 : vector<8x128xi1>, vector<8x128xf32>
    %cst_16 = arith.constant dense<0xFF800000> : vector<8xf32>
    %30 = vector.multi_reduction <maximumf>, %29, %cst_16 [1] : vector<8x128xf32> to vector<8xf32>
    %31 = vector.shape_cast %30 : vector<8xf32> to vector<8x1xf32>
    %32 = vector.broadcast %31 : vector<8x1xf32> to vector<8x128xf32>
    %33 = arith.subf %29, %32 : vector<8x128xf32>
    %34 = math.exp %33 : vector<8x128xf32>
    %cst_17 = arith.constant dense<0.000000e+00> : vector<8xf32>
    %35 = vector.multi_reduction <add>, %34, %cst_17 [1] : vector<8x128xf32> to vector<8xf32>
    %36 = vector.shape_cast %35 : vector<8xf32> to vector<8x1xf32>
    %37 = math.log %36 : vector<8x1xf32>
    %38 = vector.broadcast %37 : vector<8x1xf32> to vector<8x128xf32>
    %39 = arith.subf %33, %38 : vector<8x128xf32>
    %c0_18 = arith.constant 0 : index
    %c0_19 = arith.constant 0 : index
    %40 = vector.load %arg7[%c0_18, %c0_19] : memref<8x128xf32, #tpu.memory_space<vmem>>, vector<8x128xf32>
    tpu.vector_store %arg7[%c0_18, %c0_19], %39 {strides = array<i32>} : memref<8x128xf32, #tpu.memory_space<vmem>>, vector<8x128xf32>,
    return
  }
  func.func @transform_0(%arg0: i32) -> (i32, i32) {
    %c0_i32 = arith.constant 0 : i32
    %c0_i32_0 = arith.constant 0 : i32
    return %arg0, %c0_i32 : i32, i32
  }
  func.func @transform_1(%arg0: i32) -> (i32, i32) {
    %c0_i32 = arith.constant 0 : i32
    %c0_i32_0 = arith.constant 0 : i32
    %c0_i32_1 = arith.constant 0 : i32
    return %c0_i32, %c0_i32_0 : i32, i32
  }
  func.func @transform_2(%arg0: i32) -> (i32, i32) {
    %c0_i32 = arith.constant 0 : i32
    %c0_i32_0 = arith.constant 0 : i32
    %c0_i32_1 = arith.constant 0 : i32
    return %c0_i32, %c0_i32_0 : i32, i32
  }
  func.func @transform_3(%arg0: i32) -> (i32, i32) {
    %c0_i32 = arith.constant 0 : i32
    %c0_i32_0 = arith.constant 0 : i32
    %c0_i32_1 = arith.constant 0 : i32
    return %c0_i32, %c0_i32_0 : i32, i32
  }
  func.func @transform_4(%arg0: i32) -> (i32, i32) {
    %c0_i32 = arith.constant 0 : i32
    %c0_i32_0 = arith.constant 0 : i32
    %c0_i32_1 = arith.constant 0 : i32
    return %c0_i32, %c0_i32_0 : i32, i32
  }
  func.func @transform_5(%arg0: i32) -> (i32, i32) {
    %c0_i32 = arith.constant 0 : i32
    %c0_i32_0 = arith.constant 0 : i32
    %c0_i32_1 = arith.constant 0 : i32
    return %c0_i32, %c0_i32_0 : i32, i32
  }
  func.func @transform_6(%arg0: i32) -> (i32, i32) {
    %c0_i32 = arith.constant 0 : i32
    %c0_i32_0 = arith.constant 0 : i32
    return %arg0, %c0_i32 : i32, i32
  }
}

</mosaic_0001>

<bundles_post_ra>
// kernel: cbow_forward.1
= control target key start
LH: loop header
LB: loop body
LE: loop exit
PB: predicated region body
PF: predicated region fallthrough
CT: control target
= control target key end

     0   :  { %v25_v0 = vlaneseq  ;;  %v519_v20 = vmov 0.0   ;;  %vm195_vm8 = vcmask 1041409   ;;  %vm197_vm9 = vcmask 1042434   ;;  %s632_s0 = inlined_call_operand.vmem [shape: s32[8,8], index: 0, kind: input, shape index: {}]   ;;  %s633_s1 = inlined_call_operand.vmem [shape: bf16[128,32], index: 1, kind: input, shape index: {}]   ;;  %s634_s2 = inlined_call_operand.vmem [shape: bf16[32,128], index: 2, kind: input, shape index: {}]   ;;  %s635_s3 = inlined_call_operand.vmem [shape: f32[1,128], index: 3, kind: input, shape index: {}]   ;;  %s636_s4 = inlined_call_operand.vmem [shape: bf16[128,128], index: 4, kind: input, shape index: {}]   ;;  %s637_s5 = inlined_call_operand.vmem [shape: f32[1,128], index: 5, kind: input, shape index: {}]   ;;  %s638_s6 = inlined_call_operand.vmem [shape: f32[8,128], index: 6, kind: output, shape index: {}]  }
   0x1   :  { %v24_v2 = vld [vmem:[%s632_s0] sm:$0xff]  ;;  %v498_v11 = vld [vmem:[%s633_s1 + $0x38] sm:$0xff]  ;;  %v497_v12 = vld [vmem:[%s633_s1 + $0x30] sm:$0xff]  ;;  %vm199_vm10 = vcmask 1043459   ;;  %vm201_vm11 = vcmask 1044484   ;;  %vm203_vm12 = vcmask 1045509  }
   0x2   :  { %v29_v1 = vshrl.u32 %v25_v0, 7  ;;  %v41_v3 = vperm.slane %v24_v2, 2  ;;  %v27_v4 = vperm.slane %v24_v2, 0  ;;  %v55_v5 = vperm.slane %v24_v2, 4  ;;  %259 = vmatpush.bf16.msra.mxu0 %v498_v11  ;;  %v496_v13 = vld [vmem:[%s633_s1 + $0x28] sm:$0xff]  ;;  %v495_v15 = vld [vmem:[%s633_s1 + $0x20] sm:$0xff] }
   0x3   :  { %v48_v6 = vperm.slane %v24_v2, 3  ;;  %v34_v7 = vperm.slane %v24_v2, 1  ;;  %v62_v8 = vperm.slane %v24_v2, 5  ;;  %v76_v9 = vperm.slane %v24_v2, 7  ;;  %v494_v17 = vld [vmem:[%s633_s1 + $0x18] sm:$0xff]  ;;  %v493_v18 = vld [vmem:[%s633_s1 + $0x10] sm:$0xff] }
   0x4   :  { %511 = vset.pattern.permute.xlu1 %v29_v1  ;;  %510 = vset.pattern.permute.xlu0 %v29_v1  ;;  %v69_v10 = vperm.slane %v24_v2, 6  ;;  %v570_v16 = vand.u32 127, %v25_v0  ;;  %v492_v22 = vld [vmem:[%s633_s1 + $0x8] sm:$0xff]  ;;  %v491_v29 = vld [vmem:[%s633_s1] sm:$0xff]  ;;  %vm205_vm13 = vcmask 1046534   ;;  %vm207_vm14 = vcmask 1047559  }
   0x5   :  { %512 = vset.pattern.permute.xlu2 %v29_v1  ;;  %v500_v41 = vld [vmem:[%s634_s2 + $0x8] sm:$0xff]  ;;  %vm293_vm15 = vcmask 261120  }
   0x6   :  { %260 = vmatpush.bf16.msra.mxu0 %v497_v12  ;;  %303 = vmatpush.bf16.msra.mxu1 %v500_v41 }
   0xa   :  { %261 = vmatpush.bf16.msra.mxu0 %v496_v13 }
   0xc   :  { %46 = vperm.xlu1 %511, %v41_v3   ;;  %32 = vperm.xlu0 %510, %v27_v4  }
   0xd   :  { %60 = vperm.xlu2 %512, %v55_v5  }
   0xe   :  { %262 = vmatpush.bf16.msra.mxu0 %v495_v15 }
  0x12   :  { %263 = vmatpush.bf16.msra.mxu0 %v494_v17 }
  0x14   :  { %53 = vperm.xlu1 %511, %v48_v6   ;;  %39 = vperm.xlu0 %510, %v34_v7  }
  0x15   :  { %67 = vperm.xlu2 %512, %v62_v8  }
  0x16   :  { %264 = vmatpush.bf16.msra.mxu0 %v493_v18 }
  0x1a   :  { %265 = vmatpush.bf16.msra.mxu0 %v492_v22 }
  0x1c   :  { %81 = vperm.xlu1 %511, %v76_v9   ;;  %74 = vperm.xlu0 %510, %v69_v10  }
  0x1e   :  { %266 = vmatpush.bf16.msra.mxu0 %v491_v29 }
  0x67   :  { %v61_v14 = vpop.permute.xlu2 %60 }
  0x68   :  { %vm87_vm0 = vcmp.eq.s32.totalorder %v61_v14, %v570_v16 }
  0x69   :  { %v414_v21 = vsel %vm87_vm0, 1.0, %v519_v20  ;;  %vm393_vm0 = vcmp.lt.s32.totalorder %v570_v16, 4 }
  0x6a   :  { %v131_v23 = vrot.slane %v414_v21, 4 }
  0x6c   :  { %v132_v32 = vadd.f32 %v414_v21, %v131_v23 }
  0x6e   :  { %v133_v38 = vrot.slane %v132_v32, 2 }
  0x6f   :  { %v68_v19 = vpop.permute.xlu2 %67 }
  0x70   :  { %vm88_vm1 = vcmp.eq.s32.totalorder %v68_v19, %v570_v16  ;;  %v134_v49 = vadd.f32 %v133_v38, %v132_v32 }
  0x71   :  { %v415_v28 = vsel %vm88_vm1, 1.0, %v519_v20 }
  0x72   :  { %v137_v35 = vrot.slane %v415_v28, 4  ;;  %v135_v57 = vrot.slane %v134_v49, 1 }
  0x74   :  { %v138_v43 = vadd.f32 %v415_v28, %v137_v35  ;;  %v136_v5 = vadd.f32 %v135_v57, %v134_v49  ;;  %v507_v49 = vld [vmem:[%s636_s4 + $0x30] sm:$0xff]  ;;  %v502_v57 = vld [vmem:[%s636_s4 + $0x8] sm:$0xff] }
  0x76   :  { %v139_v51 = vrot.slane %v138_v43, 2  ;;  %v159_v18 = vpack.c.bf16 %v136_v5, %v136_v5 }
  0x78   :  { %v140_v61 = vadd.f32 %v139_v51, %v138_v43  ;;  %v505_v51 = vld [vmem:[%s636_s4 + $0x20] sm:$0xff] }
  0x7a   :  { %v141_v9 = vrot.slane %v140_v61, 1 }
  0x7c   :  { %v142_v23 = vadd.f32 %v141_v9, %v140_v61 }
  0x7e   :  { %v47_v24 = vpop.permute.xlu1 %46  ;;  %v33_v25 = vpop.permute.xlu0 %32  ;;  %v160_v32 = vpack.c.bf16 %v142_v23, %v142_v23 }
  0x7f   :  { %vm85_vm2 = vcmp.eq.s32.totalorder %v47_v24, %v570_v16  ;;  %vm83_vm3 = vcmp.eq.s32.totalorder %v33_v25, %v570_v16 }
  0x80   :  { %v412_v26 = vsel %vm85_vm2, 1.0, %v519_v20  ;;  %v410_v27 = vsel %vm83_vm3, 1.0, %v519_v20 }
  0x81   :  { %v119_v30 = vrot.slane %v412_v26, 4  ;;  %v107_v31 = vrot.slane %v410_v27, 4 }
  0x83   :  { %v120_v33 = vadd.f32 %v412_v26, %v119_v30  ;;  %v108_v34 = vadd.f32 %v410_v27, %v107_v31 }
  0x85   :  { %v121_v36 = vrot.slane %v120_v33, 2  ;;  %v109_v37 = vrot.slane %v108_v34, 2 }
  0x86   :  { %v54_v39 = vpop.permute.xlu1 %53  ;;  %v40_v40 = vpop.permute.xlu0 %39 }
  0x87   :  { %v110_v42 = vadd.f32 %v109_v37, %v108_v34  ;;  %vm86_vm4 = vcmp.eq.s32.totalorder %v54_v39, %v570_v16  ;;  %vm84_vm5 = vcmp.eq.s32.totalorder %v40_v40, %v570_v16  ;;  %v122_v44 = vadd.f32 %v121_v36, %v120_v33 }
  0x88   :  { %v413_v45 = vsel %vm86_vm4, 1.0, %v519_v20  ;;  %v411_v46 = vsel %vm84_vm5, 1.0, %v519_v20  ;;  %v191_v34 = vunpack.c.l.b16 %v159_v18  ;;  %v192_v40 = vunpack.c.l.b16 %v160_v32 }
  0x89   :  { %v125_v47 = vrot.slane %v413_v45, 4  ;;  %v113_v48 = vrot.slane %v411_v46, 4  ;;  %v111_v50 = vrot.slane %v110_v42, 1  ;;  %v123_v54 = vrot.slane %v122_v44, 1 }
  0x8b   :  { %v126_v52 = vadd.f32 %v413_v45, %v125_v47  ;;  %v114_v53 = vadd.f32 %v411_v46, %v113_v48  ;;  %v112_v60 = vadd.f32 %v111_v50, %v110_v42  ;;  %v124_v0 = vadd.f32 %v123_v54, %v122_v44  ;;  %v499_v47 = vld [vmem:[%s634_s2] sm:$0xff]  ;;  %v508_v48 = vld [vmem:[%s636_s4 + $0x38] sm:$0xff]  ;;  %v506_v50 = vld [vmem:[%s636_s4 + $0x28] sm:$0xff] }
  0x8c   :  { %304 = vmatpush.bf16.msra.mxu1 %v499_v47  ;;  %380 = vmatpush.bf16.msra.mxu2 %v508_v48 }
  0x8d   :  { %v127_v55 = vrot.slane %v126_v52, 2  ;;  %v115_v56 = vrot.slane %v114_v53, 2  ;;  %v155_v8 = vpack.c.bf16 %v112_v60, %v112_v60  ;;  %v157_v12 = vpack.c.bf16 %v124_v0, %v124_v0 }
  0x8e   :  { %v82_v58 = vpop.permute.xlu1 %81  ;;  %v75_v59 = vpop.permute.xlu0 %74 }
  0x8f   :  { %v128_v62 = vadd.f32 %v127_v55, %v126_v52  ;;  %v116_v63 = vadd.f32 %v115_v56, %v114_v53  ;;  %vm90_vm6 = vcmp.eq.s32.totalorder %v82_v58, %v570_v16  ;;  %vm89_vm7 = vcmp.eq.s32.totalorder %v75_v59, %v570_v16  ;;  %v504_v52 = vld [vmem:[%s636_s4 + $0x18] sm:$0xff]  ;;  %v503_v53 = vld [vmem:[%s636_s4 + $0x10] sm:$0xff]  ;;  %v501_v58 = vld [vmem:[%s636_s4] sm:$0xff] }
  0x90   :  { %v417_v3 = vsel %vm90_vm6, 1.0, %v519_v20  ;;  %v416_v4 = vsel %vm89_vm7, 1.0, %v519_v20  ;;  %v187_v22 = vunpack.c.l.b16 %v155_v8  ;;  %v189_v20 = vunpack.c.l.b16 %v157_v12  ;;  %381 = vmatpush.bf16.msra.mxu2 %v507_v49  ;;  %v513_v59 = vld [vmem:[%s635_s3] ss:$0 sm:$0xff] }
  0x91   :  { %v129_v1 = vrot.slane %v128_v62, 1  ;;  %v117_v2 = vrot.slane %v116_v63, 1  ;;  %v149_v6 = vrot.slane %v417_v3, 4  ;;  %v143_v7 = vrot.slane %v416_v4, 4 }
  0x93   :  { %v130_v10 = vadd.f32 %v129_v1, %v128_v62  ;;  %v118_v11 = vadd.f32 %v117_v2, %v116_v63  ;;  %v150_v13 = vadd.f32 %v417_v3, %v149_v6  ;;  %v144_v14 = vadd.f32 %v416_v4, %v143_v7  ;;  %v514_v1 = vld [vmem:[%s637_s5] ss:$0 sm:$0xff] }
  0x94   :  { %382 = vmatpush.bf16.msra.mxu2 %v506_v50 }
  0x95   :  { %v158_v15 = vpack.c.bf16 %v130_v10, %v130_v10  ;;  %v156_v17 = vpack.c.bf16 %v118_v11, %v118_v11  ;;  %v151_v19 = vrot.slane %v150_v13, 2  ;;  %v145_v21 = vrot.slane %v144_v14, 2 }
  0x97   :  { %v188_v24 = vunpack.c.l.b16 %v156_v17  ;;  %v152_v25 = vadd.f32 %v151_v19, %v150_v13  ;;  %v146_v26 = vadd.f32 %v145_v21, %v144_v14  ;;  %v190_v27 = vunpack.c.l.b16 %v158_v15 }
  0x98   :  { %383 = vmatpush.bf16.msra.mxu2 %v505_v51 }
  0x99   :  { %v196_v28 = vsel %vm195_vm8, %v188_v24, %v187_v22  ;;  %v153_v29 = vrot.slane %v152_v25, 1  ;;  %v147_v30 = vrot.slane %v146_v26, 1 }
  0x9a   :  { %v198_v31 = vsel %vm197_vm9, %v189_v20, %v196_v28 }
  0x9b   :  { %v200_v33 = vsel %vm199_vm10, %v190_v27, %v198_v31  ;;  %v154_v35 = vadd.f32 %v153_v29, %v152_v25  ;;  %v148_v36 = vadd.f32 %v147_v30, %v146_v26 }
  0x9c   :  { %v202_v39 = vsel %vm201_vm11, %v191_v34, %v200_v33  ;;  %384 = vmatpush.bf16.msra.mxu2 %v504_v52 }
  0x9d   :  { %v161_v37 = vpack.c.bf16 %v148_v36, %v148_v36  ;;  %v162_v38 = vpack.c.bf16 %v154_v35, %v154_v35  ;;  %v204_v43 = vsel %vm203_vm12, %v192_v40, %v202_v39 }
  0x9f   :  { %v193_v41 = vunpack.c.l.b16 %v161_v37  ;;  %v194_v42 = vunpack.c.l.b16 %v162_v38 }
  0xa0   :  { %385 = vmatpush.bf16.msra.mxu2 %v503_v53 }
  0xa1   :  { %v206_v44 = vsel %vm205_vm13, %v193_v41, %v204_v43 }
  0xa2   :  { %v208_v45 = vsel %vm207_vm14, %v194_v42, %v206_v44 }
  0xa3   :  { %v209_v46 = vpack.c.b16 %v208_v45, %v208_v45 }
  0xa4   :  { %386 = vmatpush.bf16.msra.mxu2 %v502_v57 }
  0xa5   :  { %267 = vmatmul.bf16.vlgmr.msra.gmra.mxu0 %v209_v46 }
  0xa8   :  { %387 = vmatpush.bf16.msra.mxu2 %v501_v58 }
 0x122   :  { %v268_v54 = vpop.f32.mrf.mxu0 }
 0x123   :  { %v272_v55 = vpack.c.bf16 %v268_v54, %v268_v54 }
 0x125   :  { %458 = vmatmul.msk.bf16.vlgmr.msra.gmra.mxu1 %vm293_vm15, %v272_v55 }
 0x12a   :  { %v270_v56 = vpop.f32.mrf.mxu0 }
 0x1a2   :  { %v306_v60 = vpop.f32.mrf.mxu1 }
 0x1a3   :  { %v307_v61 = vadd.f32 %v513_v59, %v306_v60 }
 0x1a5   :  { %v310_v62 = vmax.f32 %v307_v61, 0.0 }
 0x1a7   :  { %v311_v63 = vpack.c.bf16 %v310_v62, %v310_v62 }
 0x1a9   :  { %388 = vmatmul.bf16.vlgmr.msra.gmra.mxu2 %v311_v63 }
 0x1aa   :  { %v308_v0 = vpop.f32.mrf.mxu1 }
 0x22c   :  { %v389_v2 = vpop.f32.mrf.mxu2 }
 0x22d   :  { %v390_v3 = vadd.f32 %v514_v1, %v389_v2 }
 0x22f   :  { %v394_v4 = vsel %vm393_vm0, %v390_v3, -1e+30 }
 0x230   :  { %395 = vmax.xlane.f32.xlu2 %v394_v4 }
 0x234   :  { %v391_v5 = vpop.f32.mrf.mxu2 }
 0x2a3   :  { %v396_v6 = vpop.xlane.xlu2 %395 }
 0x2a4   :  { %v397_v7 = vsub.f32 %v394_v4, %v396_v6 }
 0x2a6   :  { %v398_v8 = vmul.f32 1.442695, %v397_v7 }
 0x2a8   :  { %515 = vpow2.f32 %v398_v8 }
 0x2ae   :  { %v516_v9 = vpop.eup %515 }
 0x2af   :  { %400 = vadd.xlane.f32.xlu0 %v516_v9 }
 0x322   :  { %v401_v10 = vpop.xlane.xlu0 %400 }
 0x323   :  { %517 = vlog2.f32 %v401_v10 }
 0x329   :  { %v518_v11 = vpop.eup %517 }
 0x32a   :  { %v403_v12 = vmul.f32 0.6931472, %v518_v11 }
 0x32c   :  { %v404_v13 = vsub.f32 %v397_v7, %v403_v12 }
 0x32e   :  { %405 = vst [vmem:[%s638_s6] sm:$0xff] %v404_v13 }

</bundles_post_ra>
